<compile_context>
chip_gen: v7x
topology: tpu7x:2x2x1
jax: 0.10.0
libtpu: 0.0.40
codegen_flags: <defaults>
</compile_context>

<pallas_src>
import functools
import math

import jax
import jax.numpy as jnp
from jax.experimental import pallas as pl
from jax.experimental.pallas import tpu as pltpu

BN_EPS = 1e-5


def _round_up(x, m):
    return ((x + m - 1) // m) * m


def _pick_tile_h(H, W, stride):
    """Row-tile height: divides H, multiple of stride, 128-lane friendly."""
    target_lanes = min(1024, max(128, (H * W) // 2))
    cands = []
    for th in range(stride, H + 1):
        if H % th or th % stride:
            continue
        out_sp = (th // stride) * (W // stride)
        in_ok = (th * W) % 128 == 0 or th == H
        out_ok = out_sp % 128 == 0 or th == H       # out BlockSpec lane rule
        if in_ok and out_ok:
            cands.append(th)
    for th in sorted(cands):
        if th * W >= target_lanes:
            return th
    return H


# ----------------------------------------------------------------------------
# Fused kernel: one (image, row-tile) per grid step, channels-first,
# spatial flattened onto the 128-lane axis.
# ----------------------------------------------------------------------------
def _bottleneck_kernel(*refs, W, tile_h, stride, connect, num_tiles, front):
    """Refs (stride == 1):
      x_ref   (1, cin, (H+2)*W)  f32   zero-row-padded input, spatial flattened
      w1_ref  (hid, cin)         bf16  expand 1x1, BN1 scale folded
      wdw_ref (hid, 9)           f32   depthwise 3x3 (tap-major), BN2 scale folded
      w3_ref  (oup, hid)         bf16  project 1x1, BN3 scale folded
      hp_ref  (hid, 4)           f32   per-channel [b1, a1, b2, a2]
      b3_ref  (oup, 1)           f32   BN3 bias
      cm_ref  (2, tile_h*W)      f32   left/right-tap column validity masks
      o_ref   (1, oup, (tile_h//stride)*(W//stride))
      pad_ref (hid, front + (tile_h+2)*W + tail)   VMEM scratch
    stride > 1 adds sel_ref (tile_h*W, out_sp) bf16 just before o_ref.
    """
    if stride > 1:
        (x_ref, w1_ref, wdw_ref, w3_ref, hp_ref, b3_ref, cm_ref, sel_ref,
         o_ref, pad_ref) = refs
    else:
        (x_ref, w1_ref, wdw_ref, w3_ref, hp_ref, b3_ref, cm_ref,
         o_ref, pad_ref) = refs
        sel_ref = None

    hid = w1_ref.shape[0]
    thw = tile_h * W
    win = (tile_h + 2) * W            # tile rows + 1-row halo on each side
    j = pl.program_id(1)

    hp = hp_ref[...]                  # (hid, 4)
    wdw = wdw_ref[...]                # (hid, 9)

    # -- x window: image rows [j*tile_h - 1, j*tile_h + tile_h + 1), i.e. rows
    #    [j*tile_h, ...+tile_h+2) of the zero-row-padded input (always in bounds).
    start = j * thw
    if thw % 128 == 0:
        start = pl.multiple_of(start, 128)
    x_win = x_ref[0, :, pl.ds(start, win)]                    # (cin, win) f32

    # -- 1x1 expand on the bf16 MXU (f32 accumulate) + BN1 bias + PReLU --------
    h = jnp.dot(w1_ref[...], x_win.astype(jnp.bfloat16),
                preferred_element_type=jnp.float32)           # (hid, win) f32
    h = h + hp[:, 0:1]
    h = jnp.where(h >= 0.0, h, hp[:, 1:2] * h)

    # -- stage h into a flat-padded scratch so every depthwise tap is one slice.
    # Only the small pad sub-ranges are zeroed (interior fully overwritten);
    # pads are read solely at column-masked positions but must stay finite.
    pad_ref[:, :front] = jnp.zeros((hid, front), jnp.float32)
    pad_ref[:, front + win:] = jnp.zeros(
        (hid, pad_ref.shape[1] - front - win), jnp.float32)
    pad_ref[:, front:front + win] = h

    # Halo rows that fall outside the image are the conv's zero padding.
    @pl.when(j == 0)
    def _():
        pad_ref[:, front:front + W] = jnp.zeros((hid, W), jnp.float32)

    @pl.when(j == num_tiles - 1)
    def _():
        pad_ref[:, front + (tile_h + 1) * W:front + win] = jnp.zeros(
            (hid, W), jnp.float32)

    # -- 3x3 depthwise: taps grouped by column offset, W-boundary mask applied
    #    once per group.  Row boundaries are handled by the zeroed halo rows.
    def tap(kh, kw):
        off = front + kh * W + (kw - 1)
        return pad_ref[:, off:off + thw] * wdw[:, kh * 3 + kw:kh * 3 + kw + 1]

    cm = cm_ref[...]
    acc_l = (tap(0, 0) + tap(1, 0) + tap(2, 0)) * cm[0:1, :]
    acc_c = tap(0, 1) + tap(1, 1) + tap(2, 1)
    acc_r = (tap(0, 2) + tap(1, 2) + tap(2, 2)) * cm[1:2, :]
    acc = acc_l + acc_c + acc_r                               # (hid, thw) f32

    # -- stride: subsample BEFORE the project matmul (everything after the
    #    depthwise is pointwise in space), keeping the output store lane-dense.
    if stride > 1:
        acc = jnp.dot(acc.astype(jnp.bfloat16), sel_ref[...],
                      preferred_element_type=jnp.float32)     # (hid, out_sp)

    z = acc + hp[:, 2:3]
    z = jnp.where(z >= 0.0, z, hp[:, 3:4] * z)

    # -- 1x1 project (bf16 MXU) + BN3 bias + optional residual ------------------
    out = jnp.dot(w3_ref[...], z.astype(jnp.bfloat16),
                  preferred_element_type=jnp.float32)         # (oup, out_sp)
    out = out + b3_ref[...]
    if connect:                          # only possible when stride == 1
        out = out + x_win[:, W:W + thw]  # f32 identity path, tile rows of x
    o_ref[0] = out.astype(o_ref.dtype)


# ----------------------------------------------------------------------------
# Module
# ----------------------------------------------------------------------------
class BottleneckPallas:
    def __init__(self, inp, oup, stride, expansion, key):
        self.connect = (stride == 1 and inp == oup)
        self.stride = stride
        self.inp, self.oup = inp, oup
        hid = inp * expansion
        self.hid = hid
        ks = jax.random.split(key, 17)

        # Conv weights (bias=False in the reference module)
        self.w1 = jax.random.normal(ks[0], (inp, hid), jnp.float32) / math.sqrt(inp)
        self.w_dw = jax.random.normal(ks[1], (3, 3, hid), jnp.float32) / 3.0
        self.w3 = jax.random.normal(ks[2], (hid, oup), jnp.float32) / math.sqrt(hid)

        def bn_params(kg, kb, km, kv, c):
            gamma = 1.0 + 0.1 * jax.random.normal(kg, (c,), jnp.float32)
            beta = 0.1 * jax.random.normal(kb, (c,), jnp.float32)
            mean = 0.1 * jax.random.normal(km, (c,), jnp.float32)
            var = jax.random.uniform(kv, (c,), jnp.float32, minval=0.5, maxval=1.5)
            scale = gamma / jnp.sqrt(var + BN_EPS)
            bias = beta - mean * scale
            return scale, bias

        self.s1, self.b1 = bn_params(ks[3], ks[4], ks[5], ks[6], hid)
        self.s2, self.b2 = bn_params(ks[7], ks[8], ks[9], ks[10], hid)
        self.s3, self.b3 = bn_params(ks[11], ks[12], ks[13], ks[14], oup)

        # PReLU per-channel slopes
        self.a1 = 0.25 + 0.05 * jax.random.normal(ks[15], (hid,), jnp.float32)
        self.a2 = 0.25 + 0.05 * jax.random.normal(ks[16], (hid,), jnp.float32)

        # ---- kernel-side params: eval-mode BN scales folded into the weights;
        #      1x1 weights stored bf16 (MXU-native), depthwise stays f32 (VPU).
        self.w1_t = (self.w1 * self.s1[None, :]).T.astype(jnp.bfloat16)   # (hid, inp)
        self.wdw_t = (self.w_dw.reshape(9, hid) * self.s2[None, :]).T     # (hid, 9)
        self.w3_t = (self.w3 * self.s3[None, :]).T.astype(jnp.bfloat16)   # (oup, hid)
        self.hpar = jnp.stack([self.b1, self.a1, self.b2, self.a2], axis=1)
        self.b3_col = self.b3.reshape(oup, 1)

    def __call__(self, x_nchw):
        n, cin, h, w = x_nchw.shape
        stride = self.stride
        if stride > 1:
            assert h % stride == 0 and w % stride == 0, \
                "TODO(synk): odd spatial sizes with stride>1 not supported"
        hout, wout = h // stride, w // stride

        tile_h = _pick_tile_h(h, w, stride)
        num_tiles = h // tile_h
        thw = tile_h * w
        win = (tile_h + 2) * w
        out_sp = (tile_h // stride) * wout        # per-tile output spatial
        front = 128                               # lane-aligned scratch front pad
        pad_cols = _round_up(front + win + 1, 128)

        # One zero row of padding top+bottom so every tile's activation window is
        # a plain in-bounds dynamic slice (the halo itself is masked in-kernel).
        x_pad = jnp.pad(x_nchw, ((0, 0), (0, 0), (1, 1), (0, 0)))
        x_pad = x_pad.reshape(n, cin, (h + 2) * w)

        # Column masks for the depthwise W boundary (left / right taps).
        col = jnp.arange(thw, dtype=jnp.int32) % w
        cmask = jnp.stack([(col >= 1), (col <= w - 2)]).astype(jnp.float32)

        kernel = functools.partial(
            _bottleneck_kernel, W=w, tile_h=tile_h, stride=stride,
            connect=self.connect, num_tiles=num_tiles, front=front)

        in_specs = [
            pl.BlockSpec((1, cin, (h + 2) * w), lambda i, j: (i, 0, 0)),
            pl.BlockSpec((self.hid, cin), lambda i, j: (0, 0)),
            pl.BlockSpec((self.hid, 9), lambda i, j: (0, 0)),
            pl.BlockSpec((self.oup, self.hid), lambda i, j: (0, 0)),
            pl.BlockSpec((self.hid, 4), lambda i, j: (0, 0)),
            pl.BlockSpec((self.oup, 1), lambda i, j: (0, 0)),
            pl.BlockSpec((2, thw), lambda i, j: (0, 0)),
        ]
        args = [x_pad, self.w1_t, self.wdw_t, self.w3_t, self.hpar,
                self.b3_col, cmask]
        if stride > 1:
            # 0/1 selection of the strided positions (exact in bf16).
            src = ((jnp.arange(tile_h // stride) * stride * w)[:, None]
                   + jnp.arange(wout) * stride).reshape(-1)          # (out_sp,)
            sel = (jnp.arange(thw)[:, None] == src[None, :]).astype(jnp.bfloat16)
            in_specs.append(pl.BlockSpec((thw, out_sp), lambda i, j: (0, 0)))
            args.append(sel)

        out_specs = pl.BlockSpec((1, self.oup, out_sp), lambda i, j: (i, 0, j))

        # Explicit scoped-VMEM limit sized from the actual per-step buffers.
        blk_in_bytes = (cin * (h + 2) * w * 4
                        + self.hid * cin * 2 + self.hid * 9 * 4
                        + self.oup * self.hid * 2
                        + self.hid * 4 * 4 + self.oup * 4
                        + 2 * thw * 4
                        + (thw * out_sp * 2 if stride > 1 else 0))
        blk_out_bytes = self.oup * out_sp * 4
        scratch_bytes = self.hid * pad_cols * 4
        vmem_limit = max(4 << 20,
                         2 * (blk_in_bytes + blk_out_bytes)
                         + scratch_bytes + (2 << 20))

        out = pl.pallas_call(
            kernel,
            grid=(n, num_tiles),
            in_specs=in_specs,
            out_specs=out_specs,
            out_shape=jax.ShapeDtypeStruct((n, self.oup, hout * wout),
                                           x_nchw.dtype),
            scratch_shapes=[pltpu.VMEM((self.hid, pad_cols), jnp.float32)],
            compiler_params=pltpu.CompilerParams(
                dimension_semantics=("parallel", "parallel"),
                vmem_limit_bytes=int(vmem_limit)),
        )(*args)

        return out.reshape(n, self.oup, hout, wout)   # already NCHW


# ----------------------------------------------------------------------------
# Pure-JAX reference (exact f32, PyTorch-equivalent; for correctness check)
# ----------------------------------------------------------------------------
def reference(x_nchw, m):
    hp = jax.lax.Precision.HIGHEST
    x = jnp.transpose(x_nchw, (0, 2, 3, 1))
    hid = m.w1.shape[1]
    y = jnp.einsum('nhwc,cd->nhwd', x, m.w1, precision=hp) * m.s1 + m.b1
    y = jnp.where(y >= 0, y, m.a1 * y)
    dw = m.w_dw.reshape(3, 3, 1, hid)
    y = jax.lax.conv_general_dilated(
        y, dw, window_strides=(m.stride, m.stride), padding=((1, 1), (1, 1)),
        dimension_numbers=('NHWC', 'HWIO', 'NHWC'),
        feature_group_count=hid, precision=hp)
    y = y * m.s2 + m.b2
    y = jnp.where(y >= 0, y, m.a2 * y)
    y = jnp.einsum('nhwc,cd->nhwd', y, m.w3, precision=hp) * m.s3 + m.b3
    if m.connect:
        y = y + x
    return jnp.transpose(y, (0, 3, 1, 2))


# ----------------------------------------------------------------------------
if __name__ == "__main__":
    key = jax.random.PRNGKey(0)
    k1, k2, kx = jax.random.split(key, 3)

    x = jax.random.normal(kx, (2, 4, 16, 16), jnp.float32)   # NCHW, like PyTorch

    # Tolerance reflects bf16 MXU operands (accumulation / elementwise stay f32);
    # structural errors (wrong tap, mask, bias, stride) would be orders larger.
    TOL = 5e-2

    # stride=1 residual ("connect") bottleneck — exercises the 2-row-tile halo path.
    m1 = BottleneckPallas(inp=4, oup=4, stride=1, expansion=2, key=k1)
    out1 = jax.block_until_ready(m1(x))
    ref1 = jax.block_until_ready(reference(x, m1))
    assert out1.shape == ref1.shape == (2, 4, 16, 16)
    assert jnp.allclose(out1, ref1, atol=TOL, rtol=TOL), "stride=1 mismatch"

    # stride=2 projection bottleneck — exercises the pre-project subsample path.
    m2 = BottleneckPallas(inp=4, oup=8, stride=2, expansion=2, key=k2)
    out2 = jax.block_until_ready(m2(x))
    ref2 = jax.block_until_ready(reference(x, m2))
    assert out2.shape == ref2.shape == (2, 8, 8, 8)
    assert jnp.allclose(out2, ref2, atol=TOL, rtol=TOL), "stride=2 mismatch"

    print("KERNEL_OK")
</pallas_src>

<mosaic_0001>
module attributes {stable_mosaic.version = 11 : i64} {
  func.func @_bottleneck_kernel(%arg0: i32, %arg1: i32, %arg2: memref<1x4x288xf32, #tpu.memory_space<vmem>>, %arg3: memref<8x4xbf16, #tpu.memory_space<vmem>>, %arg4: memref<8x9xf32, #tpu.memory_space<vmem>>, %arg5: memref<4x8xbf16, #tpu.memory_space<vmem>>, %arg6: memref<8x4xf32, #tpu.memory_space<vmem>>, %arg7: memref<4x1xf32, #tpu.memory_space<vmem>>, %arg8: memref<2x128xf32, #tpu.memory_space<vmem>>, %arg9: memref<1x4x128xf32, #tpu.memory_space<vmem>>, %arg10: memref<8x384xf32, #tpu.memory_space<vmem>>) attributes {dimension_semantics = [#tpu.dimension_semantics<parallel>, #tpu.dimension_semantics<parallel>], iteration_bounds = array<i64: 2, 2>, scalar_prefetch = 0 : i64, scratch_operands = 1 : i64, tpu.core_type = #tpu.core_type<tc>, window_params = [{transform_indices = @transform_0, window_bounds = array<i64: 1, 4, 288>}, {pipeline_mode = #tpu.pipeline_mode<synchronous>, transform_indices = @transform_1, window_bounds = array<i64: 8, 4>}, {pipeline_mode = #tpu.pipeline_mode<synchronous>, transform_indices = @transform_2, window_bounds = array<i64: 8, 9>}, {pipeline_mode = #tpu.pipeline_mode<synchronous>, transform_indices = @transform_3, window_bounds = array<i64: 4, 8>}, {pipeline_mode = #tpu.pipeline_mode<synchronous>, transform_indices = @transform_4, window_bounds = array<i64: 8, 4>}, {pipeline_mode = #tpu.pipeline_mode<synchronous>, transform_indices = @transform_5, window_bounds = array<i64: 4, 1>}, {pipeline_mode = #tpu.pipeline_mode<synchronous>, transform_indices = @transform_6, window_bounds = array<i64: 2, 128>}, {transform_indices = @transform_7, window_bounds = array<i64: 1, 4, 128>}]} {
    %c0 = arith.constant 0 : index
    %c0_0 = arith.constant 0 : index
    %0 = vector.load %arg6[%c0, %c0_0] : memref<8x4xf32, #tpu.memory_space<vmem>>, vector<8x4xf32>
    %c0_1 = arith.constant 0 : index
    %c0_2 = arith.constant 0 : index
    %1 = vector.load %arg4[%c0_1, %c0_2] : memref<8x9xf32, #tpu.memory_space<vmem>>, vector<8x9xf32>
    %c128_i32 = arith.constant 128 : i32
    %2 = arith.muli %arg1, %c128_i32 : i32
    %3 = tpu.assume_multiple %2, 128 : i32
    %c0_3 = arith.constant 0 : index
    %c0_4 = arith.constant 0 : index
    %4 = arith.index_cast %3 : i32 to index
    %5 = vector.load %arg2[%c0_3, %c0_4, %4] : memref<1x4x288xf32, #tpu.memory_space<vmem>>, vector<1x4x160xf32>
    %6 = vector.shape_cast %5 : vector<1x4x160xf32> to vector<4x160xf32>
    %c0_5 = arith.constant 0 : index
    %c0_6 = arith.constant 0 : index
    %7 = vector.load %arg3[%c0_5, %c0_6] : memref<8x4xbf16, #tpu.memory_space<vmem>>, vector<8x4xbf16>
    %8 = arith.truncf %6 : vector<4x160xf32> to vector<4x160xbf16>
    %cst = arith.constant dense<0.000000e+00> : vector<8x160xf32>
    %9 = tpu.matmul %7, %8, %cst {dimension_numbers = #tpu.dot_dimension_numbers<[1], [0], [0], [1], [0, 0, 1, 1], [], []>} : vector<8x4xbf16>, vector<4x160xbf16>, vector<8x160xf32> -> vector<8x160xf32>
    %10 = vector.extract_strided_slice %0 {offsets = [0, 0], sizes = [8, 1], strides = [1, 1]} : vector<8x4xf32> to vector<8x1xf32>
    %11 = vector.broadcast %10 : vector<8x1xf32> to vector<8x160xf32>
    %12 = arith.addf %9, %11 : vector<8x160xf32>
    %cst_7 = arith.constant 0.000000e+00 : f32
    %13 = vector.broadcast %cst_7 : f32 to vector<8x160xf32>
    %14 = arith.cmpf oge, %12, %13 : vector<8x160xf32>
    %15 = vector.extract_strided_slice %0 {offsets = [0, 1], sizes = [8, 1], strides = [1, 1]} : vector<8x4xf32> to vector<8x1xf32>
    %16 = vector.broadcast %15 : vector<8x1xf32> to vector<8x160xf32>
    %17 = arith.mulf %16, %12 : vector<8x160xf32>
    %18 = arith.select %14, %12, %17 : vector<8x160xi1>, vector<8x160xf32>
    %cst_8 = arith.constant 0.000000e+00 : f32
    %19 = vector.broadcast %cst_8 : f32 to vector<8x128xf32>
    %c0_9 = arith.constant 0 : index
    %c0_10 = arith.constant 0 : index
    %20 = vector.load %arg10[%c0_9, %c0_10] : memref<8x384xf32, #tpu.memory_space<vmem>>, vector<8x128xf32>
    tpu.vector_store %arg10[%c0_9, %c0_10], %19 {strides = array<i32>} : memref<8x384xf32, #tpu.memory_space<vmem>>, vector<8x128xf32>,
    %cst_11 = arith.constant 0.000000e+00 : f32
    %21 = vector.broadcast %cst_11 : f32 to vector<8x96xf32>
    %c0_12 = arith.constant 0 : index
    %c288 = arith.constant 288 : index
    %22 = vector.load %arg10[%c0_12, %c288] : memref<8x384xf32, #tpu.memory_space<vmem>>, vector<8x96xf32>
    tpu.vector_store %arg10[%c0_12, %c288], %21 {strides = array<i32>} : memref<8x384xf32, #tpu.memory_space<vmem>>, vector<8x96xf32>,
    %c0_13 = arith.constant 0 : index
    %c128 = arith.constant 128 : index
    %23 = vector.load %arg10[%c0_13, %c128] : memref<8x384xf32, #tpu.memory_space<vmem>>, vector<8x160xf32>
    tpu.vector_store %arg10[%c0_13, %c128], %18 {strides = array<i32>} : memref<8x384xf32, #tpu.memory_space<vmem>>, vector<8x160xf32>,
    %c0_i32 = arith.constant 0 : i32
    %24 = arith.cmpi eq, %arg1, %c0_i32 : i32
    %25 = arith.extui %24 : i1 to i32
    %c0_i32_14 = arith.constant 0 : i32
    %26 = arith.cmpi ne, %25, %c0_i32_14 : i32
    scf.if %26 {
      %cst_37 = arith.constant 0.000000e+00 : f32
      %101 = vector.broadcast %cst_37 : f32 to vector<8x16xf32>
      %c0_38 = arith.constant 0 : index
      %c128_39 = arith.constant 128 : index
      %102 = vector.load %arg10[%c0_38, %c128_39] : memref<8x384xf32, #tpu.memory_space<vmem>>, vector<8x16xf32>
      tpu.vector_store %arg10[%c0_38, %c128_39], %101 {strides = array<i32>} : memref<8x384xf32, #tpu.memory_space<vmem>>, vector<8x16xf32>,
    } else {
    }
    %c1_i32 = arith.constant 1 : i32
    %27 = arith.cmpi eq, %arg1, %c1_i32 : i32
    %28 = arith.extui %27 : i1 to i32
    %c0_i32_15 = arith.constant 0 : i32
    %29 = arith.cmpi ne, %28, %c0_i32_15 : i32
    scf.if %29 {
      %cst_37 = arith.constant 0.000000e+00 : f32
      %101 = vector.broadcast %cst_37 : f32 to vector<8x16xf32>
      %c0_38 = arith.constant 0 : index
      %c272 = arith.constant 272 : index
      %102 = vector.load %arg10[%c0_38, %c272] : memref<8x384xf32, #tpu.memory_space<vmem>>, vector<8x16xf32>
      tpu.vector_store %arg10[%c0_38, %c272], %101 {strides = array<i32>} : memref<8x384xf32, #tpu.memory_space<vmem>>, vector<8x16xf32>,
    } else {
    }
    %c0_16 = arith.constant 0 : index
    %c0_17 = arith.constant 0 : index
    %30 = vector.load %arg8[%c0_16, %c0_17] : memref<2x128xf32, #tpu.memory_space<vmem>>, vector<2x128xf32>
    %c0_18 = arith.constant 0 : index
    %c127 = arith.constant 127 : index
    %31 = vector.load %arg10[%c0_18, %c127] : memref<8x384xf32, #tpu.memory_space<vmem>>, vector<8x128xf32>
    %32 = vector.extract_strided_slice %1 {offsets = [0, 0], sizes = [8, 1], strides = [1, 1]} : vector<8x9xf32> to vector<8x1xf32>
    %33 = vector.broadcast %32 : vector<8x1xf32> to vector<8x128xf32>
    %34 = arith.mulf %31, %33 : vector<8x128xf32>
    %c0_19 = arith.constant 0 : index
    %c143 = arith.constant 143 : index
    %35 = vector.load %arg10[%c0_19, %c143] : memref<8x384xf32, #tpu.memory_space<vmem>>, vector<8x128xf32>
    %36 = vector.extract_strided_slice %1 {offsets = [0, 3], sizes = [8, 1], strides = [1, 1]} : vector<8x9xf32> to vector<8x1xf32>
    %37 = vector.broadcast %36 : vector<8x1xf32> to vector<8x128xf32>
    %38 = arith.mulf %35, %37 : vector<8x128xf32>
    %39 = arith.addf %34, %38 : vector<8x128xf32>
    %c0_20 = arith.constant 0 : index
    %c159 = arith.constant 159 : index
    %40 = vector.load %arg10[%c0_20, %c159] : memref<8x384xf32, #tpu.memory_space<vmem>>, vector<8x128xf32>
    %41 = vector.extract_strided_slice %1 {offsets = [0, 6], sizes = [8, 1], strides = [1, 1]} : vector<8x9xf32> to vector<8x1xf32>
    %42 = vector.broadcast %41 : vector<8x1xf32> to vector<8x128xf32>
    %43 = arith.mulf %40, %42 : vector<8x128xf32>
    %44 = arith.addf %39, %43 : vector<8x128xf32>
    %45 = vector.extract_strided_slice %30 {offsets = [0, 0], sizes = [1, 128], strides = [1, 1]} : vector<2x128xf32> to vector<1x128xf32>
    %46 = vector.broadcast %45 : vector<1x128xf32> to vector<8x128xf32>
    %47 = arith.mulf %44, %46 : vector<8x128xf32>
    %c0_21 = arith.constant 0 : index
    %c128_22 = arith.constant 128 : index
    %48 = vector.load %arg10[%c0_21, %c128_22] : memref<8x384xf32, #tpu.memory_space<vmem>>, vector<8x128xf32>
    %49 = vector.extract_strided_slice %1 {offsets = [0, 1], sizes = [8, 1], strides = [1, 1]} : vector<8x9xf32> to vector<8x1xf32>
    %50 = vector.broadcast %49 : vector<8x1xf32> to vector<8x128xf32>
    %51 = arith.mulf %48, %50 : vector<8x128xf32>
    %c0_23 = arith.constant 0 : index
    %c144 = arith.constant 144 : index
    %52 = vector.load %arg10[%c0_23, %c144] : memref<8x384xf32, #tpu.memory_space<vmem>>, vector<8x128xf32>
    %53 = vector.extract_strided_slice %1 {offsets = [0, 4], sizes = [8, 1], strides = [1, 1]} : vector<8x9xf32> to vector<8x1xf32>
    %54 = vector.broadcast %53 : vector<8x1xf32> to vector<8x128xf32>
    %55 = arith.mulf %52, %54 : vector<8x128xf32>
    %56 = arith.addf %51, %55 : vector<8x128xf32>
    %c0_24 = arith.constant 0 : index
    %c160 = arith.constant 160 : index
    %57 = vector.load %arg10[%c0_24, %c160] : memref<8x384xf32, #tpu.memory_space<vmem>>, vector<8x128xf32>
    %58 = vector.extract_strided_slice %1 {offsets = [0, 7], sizes = [8, 1], strides = [1, 1]} : vector<8x9xf32> to vector<8x1xf32>
    %59 = vector.broadcast %58 : vector<8x1xf32> to vector<8x128xf32>
    %60 = arith.mulf %57, %59 : vector<8x128xf32>
    %61 = arith.addf %56, %60 : vector<8x128xf32>
    %c0_25 = arith.constant 0 : index
    %c129 = arith.constant 129 : index
    %62 = vector.load %arg10[%c0_25, %c129] : memref<8x384xf32, #tpu.memory_space<vmem>>, vector<8x128xf32>
    %63 = vector.extract_strided_slice %1 {offsets = [0, 2], sizes = [8, 1], strides = [1, 1]} : vector<8x9xf32> to vector<8x1xf32>
    %64 = vector.broadcast %63 : vector<8x1xf32> to vector<8x128xf32>
    %65 = arith.mulf %62, %64 : vector<8x128xf32>
    %c0_26 = arith.constant 0 : index
    %c145 = arith.constant 145 : index
    %66 = vector.load %arg10[%c0_26, %c145] : memref<8x384xf32, #tpu.memory_space<vmem>>, vector<8x128xf32>
    %67 = vector.extract_strided_slice %1 {offsets = [0, 5], sizes = [8, 1], strides = [1, 1]} : vector<8x9xf32> to vector<8x1xf32>
    %68 = vector.broadcast %67 : vector<8x1xf32> to vector<8x128xf32>
    %69 = arith.mulf %66, %68 : vector<8x128xf32>
    %70 = arith.addf %65, %69 : vector<8x128xf32>
    %c0_27 = arith.constant 0 : index
    %c161 = arith.constant 161 : index
    %71 = vector.load %arg10[%c0_27, %c161] : memref<8x384xf32, #tpu.memory_space<vmem>>, vector<8x128xf32>
    %72 = vector.extract_strided_slice %1 {offsets = [0, 8], sizes = [8, 1], strides = [1, 1]} : vector<8x9xf32> to vector<8x1xf32>
    %73 = vector.broadcast %72 : vector<8x1xf32> to vector<8x128xf32>
    %74 = arith.mulf %71, %73 : vector<8x128xf32>
    %75 = arith.addf %70, %74 : vector<8x128xf32>
    %76 = vector.extract_strided_slice %30 {offsets = [1, 0], sizes = [1, 128], strides = [1, 1]} : vector<2x128xf32> to vector<1x128xf32>
    %77 = vector.broadcast %76 : vector<1x128xf32> to vector<8x128xf32>
    %78 = arith.mulf %75, %77 : vector<8x128xf32>
    %79 = arith.addf %47, %61 : vector<8x128xf32>
    %80 = arith.addf %79, %78 : vector<8x128xf32>
    %81 = vector.extract_strided_slice %0 {offsets = [0, 2], sizes = [8, 1], strides = [1, 1]} : vector<8x4xf32> to vector<8x1xf32>
    %82 = vector.broadcast %81 : vector<8x1xf32> to vector<8x128xf32>
    %83 = arith.addf %80, %82 : vector<8x128xf32>
    %cst_28 = arith.constant 0.000000e+00 : f32
    %84 = vector.broadcast %cst_28 : f32 to vector<8x128xf32>
    %85 = arith.cmpf oge, %83, %84 : vector<8x128xf32>
    %86 = vector.extract_strided_slice %0 {offsets = [0, 3], sizes = [8, 1], strides = [1, 1]} : vector<8x4xf32> to vector<8x1xf32>
    %87 = vector.broadcast %86 : vector<8x1xf32> to vector<8x128xf32>
    %88 = arith.mulf %87, %83 : vector<8x128xf32>
    %89 = arith.select %85, %83, %88 : vector<8x128xi1>, vector<8x128xf32>
    %c0_29 = arith.constant 0 : index
    %c0_30 = arith.constant 0 : index
    %90 = vector.load %arg5[%c0_29, %c0_30] : memref<4x8xbf16, #tpu.memory_space<vmem>>, vector<4x8xbf16>
    %91 = arith.truncf %89 : vector<8x128xf32> to vector<8x128xbf16>
    %cst_31 = arith.constant dense<0.000000e+00> : vector<4x128xf32>
    %92 = tpu.matmul %90, %91, %cst_31 {dimension_numbers = #tpu.dot_dimension_numbers<[1], [0], [0], [1], [0, 0, 1, 1], [], []>} : vector<4x8xbf16>, vector<8x128xbf16>, vector<4x128xf32> -> vector<4x128xf32>
    %c0_32 = arith.constant 0 : index
    %c0_33 = arith.constant 0 : index
    %93 = vector.load %arg7[%c0_32, %c0_33] : memref<4x1xf32, #tpu.memory_space<vmem>>, vector<4x1xf32>
    %94 = vector.broadcast %93 : vector<4x1xf32> to vector<4x128xf32>
    %95 = arith.addf %92, %94 : vector<4x128xf32>
    %96 = vector.extract_strided_slice %6 {offsets = [0, 16], sizes = [4, 128], strides = [1, 1]} : vector<4x160xf32> to vector<4x128xf32>
    %97 = arith.addf %95, %96 : vector<4x128xf32>
    %c0_34 = arith.constant 0 : index
    %c0_35 = arith.constant 0 : index
    %c0_36 = arith.constant 0 : index
    %98 = vector.load %arg9[%c0_34, %c0_35, %c0_36] : memref<1x4x128xf32, #tpu.memory_space<vmem>>, vector<1x4x128xf32>
    %99 = vector.shape_cast %98 : vector<1x4x128xf32> to vector<4x128xf32>
    %100 = vector.shape_cast %97 : vector<4x128xf32> to vector<1x4x128xf32>
    tpu.vector_store %arg9[%c0_34, %c0_35, %c0_36], %100 {strides = array<i32>} : memref<1x4x128xf32, #tpu.memory_space<vmem>>, vector<1x4x128xf32>,
    return
  }
  func.func @transform_0(%arg0: i32, %arg1: i32) -> (i32, i32, i32) {
    %c0_i32 = arith.constant 0 : i32
    %c0_i32_0 = arith.constant 0 : i32
    %c0_i32_1 = arith.constant 0 : i32
    return %arg0, %c0_i32, %c0_i32_0 : i32, i32, i32
  }
  func.func @transform_1(%arg0: i32, %arg1: i32) -> (i32, i32) {
    %c0_i32 = arith.constant 0 : i32
    %c0_i32_0 = arith.constant 0 : i32
    %c0_i32_1 = arith.constant 0 : i32
    return %c0_i32, %c0_i32_0 : i32, i32
  }
  func.func @transform_2(%arg0: i32, %arg1: i32) -> (i32, i32) {
    %c0_i32 = arith.constant 0 : i32
    %c0_i32_0 = arith.constant 0 : i32
    %c0_i32_1 = arith.constant 0 : i32
    return %c0_i32, %c0_i32_0 : i32, i32
  }
  func.func @transform_3(%arg0: i32, %arg1: i32) -> (i32, i32) {
    %c0_i32 = arith.constant 0 : i32
    %c0_i32_0 = arith.constant 0 : i32
    %c0_i32_1 = arith.constant 0 : i32
    return %c0_i32, %c0_i32_0 : i32, i32
  }
  func.func @transform_4(%arg0: i32, %arg1: i32) -> (i32, i32) {
    %c0_i32 = arith.constant 0 : i32
    %c0_i32_0 = arith.constant 0 : i32
    %c0_i32_1 = arith.constant 0 : i32
    return %c0_i32, %c0_i32_0 : i32, i32
  }
  func.func @transform_5(%arg0: i32, %arg1: i32) -> (i32, i32) {
    %c0_i32 = arith.constant 0 : i32
    %c0_i32_0 = arith.constant 0 : i32
    %c0_i32_1 = arith.constant 0 : i32
    return %c0_i32, %c0_i32_0 : i32, i32
  }
  func.func @transform_6(%arg0: i32, %arg1: i32) -> (i32, i32) {
    %c0_i32 = arith.constant 0 : i32
    %c0_i32_0 = arith.constant 0 : i32
    %c0_i32_1 = arith.constant 0 : i32
    return %c0_i32, %c0_i32_0 : i32, i32
  }
  func.func @transform_7(%arg0: i32, %arg1: i32) -> (i32, i32, i32) {
    %c0_i32 = arith.constant 0 : i32
    %c0_i32_0 = arith.constant 0 : i32
    return %arg0, %c0_i32, %arg1 : i32, i32, i32
  }
}

</mosaic_0001>

<bundles_post_ra>
// kernel: tpu_custom_call.1
= control target key start
LH: loop header
LB: loop body
LE: loop exit
PB: predicated region body
PF: predicated region fallthrough
CT: control target
= control target key end

     0   :  { %s1466_s0 = inlined_call_operand.hbm [shape: f32[2,4,288], index: 0, kind: input, shape index: {}]   ;;  %s1467_s1 = inlined_call_operand.vmem [shape: bf16[8,4], index: 1, kind: input, shape index: {}]   ;;  %s1468_s2 = inlined_call_operand.vmem [shape: f32[8,9], index: 2, kind: input, shape index: {}]   ;;  %s1469_s3 = inlined_call_operand.vmem [shape: bf16[4,8], index: 3, kind: input, shape index: {}]   ;;  %s1470_s4 = inlined_call_operand.vmem [shape: f32[8,4], index: 4, kind: input, shape index: {}]   ;;  %s1471_s5 = inlined_call_operand.vmem [shape: f32[4,1], index: 5, kind: input, shape index: {}]   ;;  %s1472_s6 = inlined_call_operand.vmem [shape: f32[2,128], index: 6, kind: input, shape index: {}]   ;;  %s1473_s7 = inlined_call_operand.hbm [shape: f32[2,4,256], index: 7, kind: output, shape index: {}]  }
   0x1   :  { %1481 = sst [smem:[#allocation15_spill]] %s1473_s7 }
   0x2   :  { %12 = vsyncpa [#allocation4], 0 }
   0x3   :  { %14 = vsyncpa [#allocation4 + $0x1], 0 }
   0x4   :  { %15 = vsyncpa [#allocation5], 0 }
   0x5   :  { %17 = vsyncpa [#allocation5 + $0x1], 0  ;;  %s1140_s24 = smov 0   ;;  %s1142_s25 = smov 0  }
   0x6   :  { %s1144_s26 = smov 0   ;;  %s1146_s27 = smov 0  }
   0x7   :  { %s1148_s28 = smov 0   ;;  %s1150_s29 = smov 0  }
   0x8   :  { %s1152_s30 = smov 0   ;;  %s1154_s8 = smov 0  }
   0x9   :  { %s1156_s9 = smov 0   ;;  %s1158_s10 = smov 0  }
   0xa   :  { %s1160_s11 = smov 0  }
   0xb LB: > { %1482 = sst [smem:[#allocation9_spill]] %s1058_s29  ;;  %s760_s12 = sadd.s32 4294967295, %s1078_s11   ;;  %s1078_s11 = sphi %s1160_s11, %s23_s11   ;;  %s1074_s10 = sphi %s1158_s10, %s1502_s10   ;;  %s1070_s9 = sphi %s1156_s9, %s1501_s9   ;;  %s1066_s8 = sphi %s1154_s8, %s1500_s8   ;;  %s1062_s30 = sphi %s1152_s30, %s1499_s30   ;;  %s1058_s29 = sphi %s1150_s29, %s1498_s29   ;;  %s1054_s28 = sphi %s1148_s28, %s1507_s28   ;;  %s1050_s27 = sphi %s1146_s27, %s1506_s27   ;;  %s1046_s26 = sphi %s1144_s26, %s1505_s26   ;;  %s1042_s25 = sphi %s1142_s25, %s1504_s25   ;;  %s1038_s24 = sphi %s1140_s24, %s1503_s24  }
   0xc   : > { %1483 = sst [smem:[#allocation10_spill]] %s1070_s9  ;;  %s761_s13 = sadd.s32 4294967294, %s1078_s11  }
   0xd   : > { %1484 = sst [smem:[#allocation11_spill]] %s1074_s10  ;;  %s32_s14 = sadd.s32 1, %s1070_s9 }
   0xe   : > { %s35_s15 = sadd.s32 1, %s1074_s10  ;;  %p33_p0 = scmp.ge.s32.totalorder %s32_s14, 2 }
   0xf   : > { %s42_s16 = sadd.s32 1, %s1058_s29  ;;  %p49_p1 = scmp.ne.s32.totalorder %s1058_s29, %s1054_s28 }
  0x10   : > { %p50_p2 = scmp.eq.s32.totalorder %s1078_s11, 0  ;;  %s1509_s14 = smov (%p33_p0, %s32_s14), 0 }
  0x11   : > { %1485 = sst [smem:[#allocation12_spill]] %s1509_s14  ;;  %s1511_s15 = smov (!%p33_p0, %s35_s15), %s1074_s10 }
  0x12   : > { %p1204_p3 = por %p50_p2, %p49_p1  ;;  %p55_p4 = scmp.ne.s32.totalorder %s1054_s28, %s1050_s27 }
  0x13   : > { %p37_p5 = scmp.ge.s32.totalorder %s1511_s15, 2  ;;  %p56_p6 = scmp.eq.s32.totalorder %s760_s12, 0 }
  0x14   : > { %s192_s18 = ssub.s32 %s1070_s9, %s1509_s14  ;;  %s196_s19 = sadd.s32 1, %s1046_s26 }
  0x15   : > { %s1513_s15 = smov (%p37_p5, %s1511_s15), 0  ;;  %p1214_p7 = por %p56_p6, %p55_p4 }
  0x16   : > { %1487 = sst [smem:[#allocation13_spill]] %s1513_s15  ;;  %p206_p8 = scmp.ne.s32.totalorder %s1046_s26, %s1042_s25 }
  0x17   : > { %s39_s21 = ssub.s32 %s1074_s10, %s1513_s15  ;;  %p207_p9 = scmp.eq.s32.totalorder %s760_s12, 3 }
  0x18   : > { %p40_p10 = scmp.eq.s32.totalorder %s39_s21, 0  ;;  %s193_s22 = sor.u32 %s192_s18, %s39_s21 }
  0x19   : > { %p194_p11 = scmp.eq.s32.totalorder %s193_s22, 0  ;;  %p1222_p12 = por %p207_p9, %p206_p8 }
  0x1a   : > { %s1227_s27 = scalar_select %p40_p10, %s1058_s29, %s42_s16  }
  0x1b   : > { %s1489_s23 = scalar_select %p1222_p12, 1, 0 }
  0x1c   : > { %1490 = sst [smem:[#allocation14_spill]] %s1227_s27  ;;  %p212_p13 = scmp.ne.s32.totalorder %s1042_s25, %s1038_s24 }
  0x1d   : > { %s1230_s14 = scalar_select %p194_p11, %s1046_s26, %s196_s19  }
  0x1e   : > { %p213_p0 = scmp.eq.s32.totalorder %s761_s13, 3  ;;  %p802_p1 = scmp.lt.s32.totalorder %s1078_s11, 4 }
  0x1f   : > { %s251_s15 = sand.u32 1, %s1058_s29   ;;  %s788_s7 = smul.u32 192, %s1074_s10 }
  0x20   : > { %p1235_p2 = por %p213_p0, %p212_p13  ;;  %s787_s12 = smul.u32 12, %s251_s15 }
  0x21   : > { %p1243_p4 = pnand %p802_p1, %p1204_p3  ;;  %s1251_s13 = scalar_lea.hbm %s1466_s0, %s788_s7 }
  0x22   : > { %s1491_s9 = scalar_select %p1235_p2, 1, 0 }
  0x23   : > { %s255_s21 = scalar_lea.vmem [#allocation3], %s787_s12  ;;  %s252_s17 = scalar_lea.sflag [#allocation4], %s251_s15 }
  0x24   : > { %s263_s22 = sshll.u32 %s255_s21, 4  ;;  %s926_s10 = scalar_lea.hbm %s1251_s13, 192  ;;  %s1253_s22 = int_to_ptr.vmem [resolvable:$true] %s263_s22 }
  0x25   : > { %p927_p3 = scmp.ne.s32.totalorder %s1251_s13, %s926_s10  ;;  %p928_p6 = pneg %p1243_p4 }
  0x26   : > { %s931_s19 = scalar_lea.hbm %s1466_s0, 384  ;;  %p932_p10 = scmp.lt.u32.totalorder %s1251_s13, %s1466_s0 }
  0x27   : > { %p929_p8 = pnand %p928_p6, %p927_p3  ;;  %p933_p11 = scmp.lt.u32.totalorder %s931_s19, %s926_s10 }
  0x28   : > { %p935_p0 = scmp.lt.u32.totalorder %s926_s10, %s1251_s13 }
  0x29   : > { %p930_p9 = pneg %p929_p8  ;;  %p934_p13 = por %p933_p11, %p932_p10 }
  0x2b   : > { %p936_p1 = por %p935_p0, %p934_p13 }
  0x2d   : > { %p937_p5 = pnand %p936_p1, %p930_p9 }
  0x2f   : > { %940 = shalt.err (!%p937_p5)
}
  0x30   : > { %s941_s15 = scalar_lea.vmem %s1253_s22, 192  ;;  %s1080_s12 = smov [#allocation3]  }
  0x31   : > { %p942_p3 = scmp.ne.s32.totalorder %s1253_s22, %s941_s15  ;;  %s946_s21 = sshll.u32 %s1080_s12, 4  ;;  %s947_s21 = int_to_ptr.vmem [resolvable:$false] %s946_s21 }
  0x32   : > { %s948_s29 = scalar_lea.vmem %s947_s21, 384  ;;  %p949_p12 = scmp.lt.s32.totalorder %s1253_s22, %s947_s21 }
  0x33   : > { %p944_p8 = pnand %p942_p3, %p928_p6  ;;  %p950_p10 = scmp.lt.s32.totalorder %s948_s29, %s941_s15 }
  0x35   : > { %p945_p2 = pneg %p944_p8  ;;  %p951_p11 = por %p950_p10, %p949_p12 }
  0x37   : > { %p952_p13 = pnand %p951_p11, %p945_p2 }
  0x39   : > { %955 = shalt.err (!%p952_p13)
}
  0x3a   : > { %797 = dma.hbm_to_vmem [thread:$0]  (!%p1243_p4), %s1251_s13, 192, %s1253_s22, %s252_s17  }
  0x3b   : > { %p268_p5 = scmp.lt.s32.totalorder %s1078_s11, 5  ;;  %p1493_p9 = scmp.ge.s32.totalorder %s1078_s11, 1 }
  0x3d   : > { %p269_p6 = pnand %p1493_p9, %p268_p5 }
  0x3e   : > { %s274_s10 = sand.u32 (!%p269_p6), 1, %s1054_s28  }
  0x3f   : > { %272 = sbr.rel (%p269_p6) target bundleno = 1055 (0x41f), region = 48  ;;  %s275_s16 = scalar_lea.sflag (!%p269_p6), [#allocation4], %s274_s10 }
  0x40   : > { %s789_s27 = smul.u32 (!%p269_p6), 12, %s274_s10 }
  0x42   : > { %s278_s7 = scalar_lea.vmem (!%p269_p6), [#allocation3], %s789_s27 }
  0x46   : > { %1029 = dma.done.wait (%p1214_p7), %s275_s16, 192  }
  0x47   : > { %1031 = vsyncadd (%p1214_p7), %s275_s16, 4294967104  ;;  %s306_s18 = sand.u32 1, %s1042_s25   ;;  %s767_s13 = sshll.u32 %s1062_s30, 7  ;;  %v1081_v0 = vmov 0   ;;  %v1299_v1 = vld [vmem:[%s1468_s2] sm:$0xff]  ;;  %vm333_vm0 = vcmask 1041408  }
  0x48   : > { %s1292_s22 = sshll.u32 %s306_s18, 2  ;;  %s313_s17 = sshra.s32 %s767_s13, 7  ;;  %372 = vmatprep.mubr.bf16.mxu0 %v1081_v0  ;;  %910 = vset.pattern.permute.xlu0 %v1081_v0  ;;  %v1312_v5 = vld [vmem:[%s1470_s4] sm:$0xff]  ;;  %vm329_vm1 = vcmask 31744   ;;  %v1082_v9 = vmov 1   ;;  %vm392_vm2 = vcmask 1047808  }
  0x49   : > { %s768_s19 = sshll.u32 %s313_s17, 2  ;;  %326 = vperm.xlu0 %910, %v1312_v5   ;;  %v318_v8 = vld [vmem:[%s1467_s1] sm:$0xf]  ;;  %v1083_v10 = vmov 0.0   ;;  %vm395_vm5 = vcmask 261120   ;;  %s308_s16 = scalar_lea.vmem [#allocation6], %s1292_s22 }
  0x4a   : > { %s316_s15 = scalar_lea.vmem %s278_s7, %s768_s19 [#allocation3]  ;;  %391 = vst [vmem:[#allocation2] sm:$0xff] %v1083_v10  ;;  %393 = vst.msk [vmem:[#allocation2 + $0x10] sm:$0xff] %vm392_vm2, %v1083_v10  ;;  %p771_p7 = scmp.ne.s32.totalorder %s1062_s30, 0 }
  0x4b   : > { %v1301_v2 = vld [vmem:[%s316_s15] sm:$0xff]  ;;  %vm401_vm6 = vcmask (!%p771_p7), 130048   ;;  %v1084_v23 = vmov (!%p771_p7), 0.0  }
  0x4c   : > { %v1305_v3 = vcombine.high %v1301_v2, %v1301_v2  ;;  %v322_v4 = vpack.c.bf16 %v1301_v2, %v1301_v2 }
  0x4d   : > { %911 = vset.pattern.permute.xlu0 %v1082_v9 }
  0x4e   : > { %v323_v6 = vpack.c.bf16 %v1305_v3, %v1305_v3  ;;  %v335_v7 = vsel %vm333_vm0, %v322_v4, 0  ;;  %384 = vperm.xlu0 %911, %v1312_v5  }
  0x50   : > { %769 = vmatprep.subr.msk.bf16.mxu0 %vm333_vm0, %v323_v6 }
  0x51   : > { %341 = vmatpush1.bf16.msra.mxu0 %v335_v7 }
  0x54   : > { %770 = vmatmul.mubr.msk.bf16.vlgmr.msra.gmra.mrb[0].mxu0 %vm329_vm1, %v318_v8 }
  0xc8   : > { %v327_v11 = vpop.permute.xlu0 %326 }
  0xcd   : > { %v385_v13 = vpop.permute.xlu0 %384 }
 0x127   : > { %v374_v12 = vpop.f32.mrb[0].mxu0 }
 0x128   : > { %v375_v14 = vadd.f32 %v374_v12, %v327_v11  ;;  %v376_v15 = vpop.f32.mrb[1].mxu0  ;;  %400 = sbr.rel (%p771_p7) target bundleno = 304 (0x130), region = 56 }
 0x129   : > { %v377_v16 = vadd.f32 %v376_v15, %v327_v11  ;;  %v378_v17 = vpop.f32.mrb[2].mxu0 }
 0x12a   : > { %vm381_vm3 = vcmp.ge.f32.partialorder %v375_v14, 0.0  ;;  %v387_v18 = vmul.f32 %v385_v13, %v375_v14  ;;  %v379_v19 = vpop.f32.mrb[3].mxu0 }
 0x12b   : > { %vm382_vm4 = vcmp.ge.f32.partialorder %v377_v16, 0.0  ;;  %v388_v20 = vmul.f32 %v385_v13, %v377_v16 }
 0x12c   : > { %v389_v21 = vsel %vm381_vm3, %v375_v14, %v387_v18 }
 0x12d   : > { %v390_v22 = vsel %vm382_vm4, %v377_v16, %v388_v20  ;;  %394 = vst [vmem:[#allocation2 + $0x8] sm:$0xff] %v389_v21 }
 0x12e   : > { %396 = vst.msk [vmem:[#allocation2 + $0x10] sm:$0xff] %vm395_vm5, %v390_v22 }
 0x12f   : > { %402 = vst.msk [vmem:[#allocation2 + $0x8] sm:$0xff] %vm401_vm6, %v1084_v23 }
 0x130 PF: > { %p772_p12 = scmp.ne.s32.totalorder %s1062_s30, 1 }
 0x131   : > { %vm407_vm7 = vcmask (!%p772_p12), 261248   ;;  %v1085_v24 = vmov (!%p772_p12), 0.0  }
 0x132   : > { %406 = sbr.rel (%p772_p12) target bundleno = 313 (0x139), region = 60  ;;  %408 = vst.msk [vmem:[#allocation2 + $0x10] sm:$0xff] (!%p772_p12), %vm407_vm7, %v1085_v24 }
 0x139 PF: > { %781 = vmatprep.subr.bf16.mxu1 %v1083_v10  ;;  %v1086_v25 = vmov 5   ;;  %v1087_v26 = vmov 8   ;;  %v1088_v27 = vmov 4   ;;  %v1089_v28 = vmov 7   ;;  %v1336_v32 = vld [vmem:[#allocation2 + $0x8] sm:$0xff]  ;;  %v1338_v33 = vld [vmem:[#allocation2 + $0x10] sm:$0xff] }
 0x13a   : > { %913 = vset.pattern.permute.xlu0 %v1086_v25  ;;  %915 = vset.pattern.permute.xlu1 %v1087_v26  ;;  %v1090_v29 = vmov 3   ;;  %v1091_v30 = vmov 6   ;;  %v1092_v31 = vmov 2   ;;  %s1093_s7 = smov 112   ;;  %v457_v38 = vlaneseq  ;;  %s1094_s13 = smov 96  }
 0x13b   : > { %509 = vperm.xlu0 %913, %v1299_v1   ;;  %526 = vperm.xlu1 %915, %v1299_v1   ;;  %v409_v49 = vld [vmem:[%s1472_s6] sm:$0x3]  ;;  %s1095_s15 = smov 1   ;;  %s1096_s12 = smov 127   ;;  %vm433_vm8 = vcmask 916480   ;;  %vm451_vm9 = vcmask 785408  }
 0x13c   : > { %v458_v44 = vshrl.u32 %v457_v38, 7  ;;  %s1097_s21 = smov 126   ;;  %vm564_vm10 = vcmask 1031168   ;;  %vm1098_vm11 = vmmov 0   ;;  %vm601_vm14 = vcmask 7168   ;;  %s675_s19 = sshll.u32 %s308_s16, 4  ;;  %s1402_s19 = int_to_ptr.vmem [resolvable:$true] %s675_s19 }
 0x13d   : > { %783 = vmatprep.mubr.msk.bf16.mxu1 %vm1098_vm11, %v1083_v10  ;;  %vm607_vm15 = vcmask 1043456   ;;  %vm603_vm0 = vcmask 64512   ;;  %s956_s20 = scalar_lea.vmem %s1402_s19, 64  ;;  %p1495_p4 = scmp.ne.s32.totalorder %s1489_s23, 0 }
 0x13e   : > { %v544_v48 = vsub.s32 1, %v458_v44  ;;  %v459_v51 = vsub.s32 0, %v458_v44  ;;  %p957_p2 = scmp.ne.s32.totalorder %s1402_s19, %s956_s20  ;;  %s1099_s29 = smov [#allocation6]  }
 0x13f   : > { %914 = vset.pattern.permute.xlu0 %v1088_v27  ;;  %916 = vset.pattern.permute.xlu1 %v1089_v28  ;;  %v410_v27 = vld [vmem:[#allocation2] sm:$0xff]  ;;  %s960_s10 = sshll.u32 %s1099_s29, 4  ;;  %s961_s10 = int_to_ptr.vmem [resolvable:$false] %s960_s10 }
 0x140   : > { %473 = vperm.xlu0 %914, %v1299_v1   ;;  %488 = vperm.xlu1 %916, %v1299_v1   ;;  %v545_v50 = vrot.slane %v409_v49, %v544_v48  ;;  %v460_v52 = vrot.slane %v409_v49, %v459_v51  ;;  %p958_p0 = pnand %p957_p2, %p1495_p4  ;;  %s962_s27 = scalar_lea.vmem %s961_s10, 128 }
 0x141   : > { %p963_p3 = scmp.lt.s32.totalorder %s1402_s19, %s961_s10  ;;  %p964_p8 = scmp.lt.s32.totalorder %s962_s27, %s956_s20 }
 0x142   : > { %p959_p1 = pneg %p958_p0 }
 0x143   : > { %p965_p10 = por %p964_p8, %p963_p3 }
 0x144   : > { %917 = vset.pattern.permute.xlu1 %v1090_v29  ;;  %918 = vset.pattern.permute.xlu0 %v1091_v30 }
 0x145   : > { %422 = vperm.xlu1 %917, %v1299_v1   ;;  %440 = vperm.xlu0 %918, %v1299_v1   ;;  %p966_p11 = pnand %p965_p10, %p959_p1 }
 0x149   : > { %919 = vset.pattern.permute.xlu1 %v1092_v31  ;;  %922 = vset.pattern.permute.xlu0 %v1092_v31 }
 0x14a   : > { %503 = vperm.xlu1 %919, %v1299_v1  }
 0x14e   : > { %920 = vset.pattern.permute.xlu1 %v1082_v9 }
 0x14f   : > { %468 = vperm.xlu1 %920, %v1299_v1  }
 0x153   : > { %921 = vset.pattern.permute.xlu1 %v1081_v0 }
 0x1ba   : > { %v510_v34 = vpop.permute.xlu0 %509  ;;  %v527_v37 = vpop.permute.xlu1 %526 }
 0x1bb   : > { %v512_v35 = vmul.f32 %v510_v34, %v1336_v32  ;;  %v513_v36 = vmul.f32 %v510_v34, %v1338_v33  ;;  %v529_v42 = vmul.f32 %v527_v37, %v1336_v32  ;;  %v530_v43 = vmul.f32 %v527_v37, %v1338_v33 }
 0x1bd   : > { %518 = vrot.lane.b32.xlu1 %v513_v36, %s1093_s7  ;;  %516 = vrot.lane.b32.xlu0 %v512_v35, %s1093_s7 }
 0x1bf   : > { %v474_v39 = vpop.permute.xlu0 %473  ;;  %v489_v45 = vpop.permute.xlu1 %488 }
 0x1c0   : > { %v476_v40 = vmul.f32 %v474_v39, %v1336_v32  ;;  %v477_v41 = vmul.f32 %v474_v39, %v1338_v33  ;;  %v491_v46 = vmul.f32 %v489_v45, %v1336_v32  ;;  %v492_v47 = vmul.f32 %v489_v45, %v1338_v33 }
 0x1c2   : > { %482 = vrot.lane.b32.xlu1 %v477_v41, %s1093_s7  ;;  %480 = vrot.lane.b32.xlu0 %v476_v40, %s1093_s7 }
 0x1c4   : > { %v423_v53 = vpop.permute.xlu1 %422  ;;  %v441_v56 = vpop.permute.xlu0 %440 }
 0x1c5   : > { %v425_v54 = vmul.f32 %v423_v53, %v1336_v32  ;;  %v426_v55 = vmul.f32 %v423_v53, %v1338_v33  ;;  %v443_v57 = vmul.f32 %v441_v56, %v1336_v32  ;;  %v444_v58 = vmul.f32 %v441_v56, %v1338_v33 }
 0x1c6   : > { %535 = vrot.lane.b32.xlu1 %v530_v43, %s1094_s13  ;;  %533 = vrot.lane.b32.xlu0 %v529_v42, %s1094_s13 }
 0x1c9   : > { %v504_v59 = vpop.permute.xlu1 %503 }
 0x1ca   : > { %497 = vrot.lane.b32.xlu1 %v492_v47, %s1094_s13  ;;  %495 = vrot.lane.b32.xlu0 %v491_v46, %s1094_s13 }
 0x1ce   : > { %547 = vrot.lane.b32.xlu0 %v545_v50, %s1095_s15  ;;  %414 = vperm.xlu1 %921, %v1299_v1   ;;  %v469_v60 = vpop.permute.xlu1 %468 }
 0x1cf   : > { %v471_v8 = vmul.f32 %v469_v60, %v1336_v32 }
 0x1d2   : > { %571 = vperm.xlu0 %922, %v1312_v5   ;;  %462 = vrot.lane.b32.xlu1 %v460_v52, %s1096_s12 }
 0x1d3   : > { %923 = vset.pattern.permute.xlu1 %v1090_v29 }
 0x1d6   : > { %429 = vrot.lane.b32.xlu0 %v425_v54, %s1093_s7  ;;  %431 = vrot.lane.b32.xlu1 %v426_v55, %s1093_s7 }
 0x1d7   : > { %925 = vset.pattern.permute.xlu0 %v1081_v0 }
 0x1da   : > { %447 = vrot.lane.b32.xlu0 %v443_v57, %s1094_s13  ;;  %449 = vrot.lane.b32.xlu1 %v444_v58, %s1094_s13  ;;  %s775_s13 = sshll.u32 %s1066_s8, 1 }
 0x1de   : > { %579 = vperm.xlu1 %923, %v1312_v5   ;;  %v506_v5 = vmul.f32 %v504_v59, %v1336_v32 }
 0x1e2   : > { %924 = vset.pattern.permute.xlu1 %v1081_v0  ;;  %v507_v0 = vmul.f32 %v504_v59, %v1338_v33  ;;  %v589_v59 = vld [vmem:[%s1471_s5] sm:$0xf] }
 0x22f   : > { %v519_v61 = vpop.permute.xlu1 %518  ;;  %v517_v62 = vpop.permute.xlu0 %516 }
 0x230   : > { %v520_v9 = vsel %vm433_vm8, %v517_v62, %v519_v61  ;;  %v524_v15 = vadd.f32 %v519_v61, %v507_v0 }
 0x231   : > { %v523_v16 = vadd.f32 %v520_v9, %v506_v5 }
 0x234   : > { %v483_v63 = vpop.permute.xlu1 %482  ;;  %v481_v1 = vpop.permute.xlu0 %480 }
 0x235   : > { %v484_v7 = vsel %vm433_vm8, %v481_v1, %v483_v63  ;;  %v586_v63 = vld [vmem:[%s1469_s3] sm:$0x3] }
 0x236   : > { %v486_v11 = vadd.f32 %v484_v7, %v471_v8 }
 0x238   : > { %v536_v4 = vpop.permute.xlu1 %535  ;;  %v534_v6 = vpop.permute.xlu0 %533 }
 0x239   : > { %v537_v12 = vsel %vm451_vm9, %v534_v6, %v536_v4  ;;  %v541_v19 = vadd.f32 %v536_v4, %v524_v15 }
 0x23a   : > { %v540_v20 = vadd.f32 %v537_v12, %v523_v16 }
 0x23c   : > { %v498_v13 = vpop.permute.xlu1 %497  ;;  %v496_v14 = vpop.permute.xlu0 %495 }
 0x23d   : > { %v499_v17 = vsel %vm451_vm9, %v496_v14, %v498_v13 }
 0x23e   : > { %v501_v18 = vadd.f32 %v499_v17, %v486_v11 }
 0x240   : > { %553 = vrot.lane.b32.xlu0 %v501_v18, %s1096_s12  ;;  %v548_v21 = vpop.permute.xlu0 %547 }
 0x241   : > { %v550_v22 = vmul.f32 %v548_v21, %v540_v20  ;;  %v551_v23 = vmul.f32 %v548_v21, %v541_v19 }
 0x243   : > { %560 = vrot.lane.b32.xlu1 %v550_v22, %s1097_s21 }
 0x244   : > { %562 = vrot.lane.b32.xlu0 %v551_v23, %s1097_s21  ;;  %s1494_s21 = sld [smem:[#allocation15_spill]] }
 0x24d   : > { %v415_v24 = vpop.permute.xlu1 %414 }
 0x24e   : > { %v417_v30 = vmul.f32 %v415_v24, %v410_v27  ;;  %v418_v31 = vmul.f32 %v1336_v32, %v415_v24 }
 0x251   : > { %v572_v25 = vpop.permute.xlu0 %571  ;;  %v463_v26 = vpop.permute.xlu1 %462 }
 0x255   : > { %v430_v28 = vpop.permute.xlu0 %429  ;;  %v432_v29 = vpop.permute.xlu1 %431 }
 0x256   : > { %v437_v33 = vadd.f32 %v430_v28, %v417_v30  ;;  %v434_v34 = vsel %vm433_vm8, %v430_v28, %v432_v29 }
 0x257   : > { %v438_v37 = vadd.f32 %v434_v34, %v418_v31 }
 0x259   : > { %v448_v35 = vpop.permute.xlu0 %447  ;;  %v450_v36 = vpop.permute.xlu1 %449 }
 0x25a   : > { %v455_v38 = vadd.f32 %v448_v35, %v437_v33  ;;  %v452_v39 = vsel %vm451_vm9, %v448_v35, %v450_v36 }
 0x25b   : > { %v456_v41 = vadd.f32 %v452_v39, %v438_v37 }
 0x25c   : > { %v465_v42 = vmul.f32 %v463_v26, %v455_v38 }
 0x25d   : > { %v580_v40 = vpop.permute.xlu1 %579  ;;  %v466_v45 = vmul.f32 %v463_v26, %v456_v41 }
 0x2b2   : > { %v554_v43 = vpop.permute.xlu0 %553 }
 0x2b3   : > { %v556_v44 = vadd.f32 %v554_v43, %v465_v42  ;;  %v557_v47 = vadd.f32 %v554_v43, %v466_v45 }
 0x2b5   : > { %v561_v46 = vpop.permute.xlu1 %560 }
 0x2b6   : > { %v568_v48 = vadd.f32 %v561_v46, %v556_v44  ;;  %v563_v32 = vpop.permute.xlu0 %562 }
 0x2b7   : > { %v565_v49 = vsel %vm564_vm10, %v561_v46, %v563_v32 }
 0x2b8   : > { %v574_v50 = vadd.f32 %v572_v25, %v568_v48  ;;  %v569_v51 = vadd.f32 %v565_v49, %v557_v47 }
 0x2ba   : > { %v582_v52 = vmul.f32 %v580_v40, %v574_v50  ;;  %v575_v53 = vadd.f32 %v572_v25, %v569_v51  ;;  %vm576_vm12 = vcmp.ge.f32.partialorder %v574_v50, 0.0 }
 0x2bc   : > { %v584_v54 = vsel %vm576_vm12, %v574_v50, %v582_v52  ;;  %vm577_vm13 = vcmp.ge.f32.partialorder %v575_v53, 0.0  ;;  %v583_v55 = vmul.f32 %v580_v40, %v575_v53 }
 0x2bd   : > { %v587_v56 = vpack.c.bf16 %v584_v54, %v584_v54 }
 0x2be   : > { %v585_v57 = vsel %vm577_vm13, %v575_v53, %v583_v55 }
 0x2bf   : > { %597 = vrot.lane.b32.xlu1 %v587_v56, %s1095_s15  ;;  %v588_v58 = vpack.c.bf16 %v585_v57, %v585_v57 }
 0x2c1   : > { %599 = vrot.lane.b32.xlu0 %v588_v58, %s1095_s15 }
 0x2c3   : > { %592 = vperm.xlu1 %924, %v589_v59  }
 0x2c5   : > { %651 = vrot.lane.b32.xlu0 %v1301_v2, %s1093_s7 }
 0x2c7   : > { %653 = vrot.lane.b32.xlu1 %v1305_v3, %s1093_s7  ;;  %s671_s7 = sadd.s32 %s1062_s30, %s775_s13  ;;  %s660_s30 = scalar_lea.sflag [#allocation5], %s306_s18 }
 0x2c8   : > { %s776_s17 = sshll.u32 %s671_s7, 6 }
 0x2c9   : > { %s1400_s8 = scalar_lea.hbm %s1494_s21, %s776_s17 }
 0x331   : > { %v598_v10 = vpop.permute.xlu1 %597 }
 0x333   : > { %v600_v60 = vpop.permute.xlu0 %599 }
 0x334   : > { %v602_v61 = vsel %vm601_vm14, %v598_v10, %v600_v60 }
 0x335   : > { %v609_v62 = vsel %vm607_vm15, %v602_v61, 0 }
 0x336   : > { %782 = vmatpush3.bf16.msra.mxu1 %v609_v62 }
 0x337   : > { %v652_v3 = vpop.permute.xlu0 %651 }
 0x339   : > { %784 = vmatmul.mubr.msk.bf16.vlgmr.msra.gmra.mrb[0].mxu1 %vm603_vm0, %v586_v63 }
 0x342   : > { %v593_v1 = vpop.permute.xlu1 %592 }
 0x346   : > { %v654_v2 = vpop.permute.xlu1 %653 }
 0x347   : > { %v655_v6 = vsel %vm433_vm8, %v652_v3, %v654_v2 }
 0x40c   : > { %v645_v4 = vpop.f32.mrb[0].mxu1 }
 0x40d   : > { %v646_v7 = vadd.f32 %v645_v4, %v593_v1  ;;  %v785_v8 = vpop.f32.mrb[1].mxu1 }
 0x40e   : > { %v648_v9 = vpop.f32.mrb[2].mxu1 }
 0x40f   : > { %v657_v5 = vadd.f32 %v655_v6, %v646_v7  ;;  %v786_v0 = vpop.f32.mrb[3].mxu1 }
 0x411   : > { %658 = vst [vmem:[%s308_s16] sm:$0xf] %v657_v5 }
 0x412   : > { %969 = shalt.err (!%p966_p11)
}
 0x413   : > { %s970_s18 = scalar_lea.hbm %s1400_s8, 64  ;;  %s974_s13 = scalar_lea.hbm %s1494_s21, 256 }
 0x414   : > { %p971_p13 = scmp.ne.s32.totalorder %s1400_s8, %s970_s18  ;;  %p975_p6 = scmp.lt.u32.totalorder %s1400_s8, %s1494_s21 }
 0x415   : > { %p976_p7 = scmp.lt.u32.totalorder %s974_s13, %s970_s18  ;;  %p978_p2 = scmp.lt.u32.totalorder %s970_s18, %s1400_s8 }
 0x416   : > { %p972_p5 = pnand %p971_p13, %p1495_p4 }
 0x417   : > { %p977_p12 = por %p976_p7, %p975_p6 }
 0x418   : > { %p973_p9 = pneg %p972_p5 }
 0x419   : > { %p979_p0 = por %p978_p2, %p977_p12 }
 0x41b   : > { %p980_p1 = pnand %p979_p0, %p973_p9 }
 0x41d   : > { %983 = shalt.err (!%p980_p1)
}
 0x41e   : > { %792 = dma.vmem_to_hbm [thread:$0]  (%p1495_p4), %s1402_s19, 64, %s1400_s8, %s660_s30  }
 0x41f PF: > { %p803_p3 = scmp.ge.s32.totalorder %s1078_s11, 2  ;;  %s687_s15 = sand.u32 1, %s1038_s24  }
 0x420   : > { %p1496_p8 = scmp.ne.s32.totalorder %s1491_s9, 0  ;;  %s688_s12 = scalar_lea.sflag [#allocation5], %s687_s15 }
 0x422   : > { %p799_p10 = pnand %p803_p3, %p1496_p8 }
 0x424   : > { %1033 = dma.done.wait (!%p799_p10), %s688_s12, 64  }
 0x425   : > { %1035 = vsyncadd (!%p799_p10), %s688_s12, 4294967232  ;;  %s23_s11 = sadd.s32 1, %s1078_s11   ;;  %s1497_s23 = sld [smem:[#allocation9_spill]] }
 0x426   : > { %p20_p11 = scmp.ge.s32.totalorder %s23_s11, 6   ;;  %s1498_s29 = sld [smem:[#allocation14_spill]] }
 0x427   : > { %s1499_s30 = sld [smem:[#allocation10_spill]]  ;;  %s1500_s8 = sld [smem:[#allocation11_spill]] }
 0x428   : > { %s1501_s9 = sld [smem:[#allocation12_spill]]  ;;  %s1502_s10 = sld [smem:[#allocation13_spill]] }
 0x429   : > { %s1503_s24 = smov %s1042_s25  ;;  %s1504_s25 = smov %s1046_s26 }
 0x42a   : > { %s1505_s26 = smov %s1230_s14  ;;  %s1506_s27 = smov %s1054_s28 }
 0x42b   : > { %s1507_s28 = smov %s1497_s23  ;;  %22 = sbr.rel (!%p20_p11) target bundleno = 11 (0xb), region = 102 }
 0x432   :  { %693 = vsyncpa [#allocation4], 1 }
 0x433   :  { %695 = vsyncpa [#allocation4 + $0x1], 1 }
 0x434   :  { %696 = vsyncpa [#allocation5], 1 }
 0x435   :  { %698 = vsyncpa [#allocation5 + $0x1], 1 }

</bundles_post_ra>
